<compile_context>
chip_gen: v7x
topology: tpu7x:2x2x1
jax: 0.10.0
libtpu: 0.0.40
codegen_flags: <defaults>
</compile_context>

<pallas_src>
import jax
import jax.numpy as jnp
from jax import lax
from jax.experimental import pallas as pl
from jax.experimental.pallas import tpu as pltpu

# ---------------------------------------------------------------------------
# Tuning constants
# ---------------------------------------------------------------------------
_MIB = 1024 * 1024
_FAST_PATH_BLOCK_TOKENS = 512     # keeps MXU M-dim >= 256 on v6e/v7x, halves grid steps
_HBM_PATH_BLOCK_TOKENS = 256      # descriptor-issue bound; bigger blocks amortize waits
_ONEHOT_MAX_VOCAB_16BIT = 4096    # bf16/f16 tables: one-hot matmul cheap on v6e/v7x MXU
_ONEHOT_MAX_VOCAB_32BIT = 2048    # f32 matmul is multi-pass bf16 on the MXU (esp. v5e)
_DMA_ISSUE_UNROLL = 8             # approach the 1-descriptor/bundle issue floor


def _round_up(x, m):
    return ((x + m - 1) // m) * m


def _vmem_capacity_bytes():
    """Physical VMEM of the local chip (128 MiB v5e/v6e, 64 MiB per TC on v7x)."""
    try:
        cap = int(pltpu.get_tpu_info().vmem_capacity_bytes)
        if cap > 0:
            return min(cap, 128 * _MIB)
    except Exception:
        pass
    return 64 * _MIB  # conservative fallback (v7x per-TC)


def _vmem_limit(need_bytes, capacity):
    # The scoped default (16 MiB v5e / 32 MiB v6e,v7x) would cap larger tiles.
    return int(min(capacity, 128 * _MIB, max(need_bytes + 4 * _MIB, 32 * _MIB)))


# ---------------------------------------------------------------------------
# Kernels
# ---------------------------------------------------------------------------
def _embed_onehot_kernel(tok_ref, table_ref, out_ref):
    """Small-table fast path: table resident in VMEM (fetched from HBM once,
    constant index_map).  The gather of TB rows per grid step is a one-hot
    matmul on the otherwise-idle MXU, producing a dense (TB, D) output tile.

    TODO(synk): switch to an in-kernel jnp.take row gather (bit-exact, no
    wasted V*D FLOPs) once dynamic-gather lowering is guaranteed for arbitrary
    vocab sizes; the one-hot matmul stays as the fallback.
    """
    v = table_ref.shape[0]
    ids = jnp.clip(tok_ref[...].astype(jnp.int32), 0, v - 1)          # (TB, 1)
    tb = ids.shape[0]
    onehot = (lax.broadcasted_iota(jnp.int32, (tb, v), 1) == ids)
    onehot = onehot.astype(table_ref.dtype)                           # (TB, V)
    out_ref[...] = jnp.dot(
        onehot, table_ref[...], preferred_element_type=jnp.float32
    ).astype(out_ref.dtype)


def _embed_hbm_gather_kernel(tok_ref, table_ref, out_ref, sem_ref):
    """Large-table path: table stays in HBM (memory_space=pl.ANY).

    Per grid step:
      * issue TB row DMAs (table.at[token] -> out_ref row) from an unrolled
        loop (the path is descriptor-issue bound: ~1 descriptor / bundle),
      * wait ONCE with a descriptor covering the whole (TB, D) tile -- DMA
        semaphores count bytes, and the TB row copies sum to exactly that,
      * no VMEM->VMEM copy and no cross-step scratch state, so the grid axis
        can be scheduled "parallel" (uses both TensorCores on v7x).
    """
    tb, _ = out_ref.shape
    v = table_ref.shape[0]

    def issue(r, carry):
        t = jnp.clip(tok_ref[r], 0, v - 1)         # scalar token id from SMEM
        pltpu.make_async_copy(
            table_ref.at[pl.ds(t, 1), :],
            out_ref.at[pl.ds(r, 1), :],
            sem_ref.at[0],
        ).start()
        return carry

    lax.fori_loop(0, tb, issue, 0, unroll=_DMA_ISSUE_UNROLL)

    # Single batched wait for all TB row copies issued above: the descriptor's
    # byte count (TB * D * itemsize) equals the sum of the row-copy signals.
    pltpu.make_async_copy(out_ref, out_ref, sem_ref.at[0]).wait()


# ---------------------------------------------------------------------------
# Wrapper
# ---------------------------------------------------------------------------
def embedding_lookup(tokens, table, *, block_tokens=None, force_hbm_gather=False):
    """tokens: int[...]; table: [V, D]  ->  [..., D] (embedding gather).

    Out-of-range ids are clamped to [0, V-1].
    # TODO(synk): nn.Embedding raises on out-of-range ids and supports
    # padding_idx; neither behavior is modeled here.
    """
    lead_shape = tokens.shape
    v, d = table.shape
    itemsize = jnp.dtype(table.dtype).itemsize

    flat = tokens.reshape(-1).astype(jnp.int32)
    n = flat.shape[0]

    capacity = _vmem_capacity_bytes()
    table_bytes = v * d * itemsize
    onehot_cap = (_ONEHOT_MAX_VOCAB_16BIT if itemsize <= 2
                  else _ONEHOT_MAX_VOCAB_32BIT)

    # Resident-table fast path: (double-buffered) table must fit in ~half of
    # this generation's VMEM and the vocab must be small enough that the
    # one-hot matmul's wasted FLOPs stay cheap.
    use_resident_table = (
        not force_hbm_gather
        and v <= onehot_cap
        and 2 * table_bytes <= capacity // 2
    )

    # Token-block size TB: multiple of 8, sized against the per-generation VMEM.
    if use_resident_table:
        if block_tokens is None:
            block_tokens = _FAST_PATH_BLOCK_TOKENS
        per_token = 2 * d * itemsize + 4 * v          # out tiles (x2) + f32 one-hot row
        avail = int(0.85 * capacity) - 2 * table_bytes - 4 * _MIB
        tb_max = max(8, (avail // per_token) // 8 * 8)
    else:
        if block_tokens is None:
            block_tokens = _HBM_PATH_BLOCK_TOKENS
        per_token = 2 * d * itemsize                  # double-buffered output rows
        avail = capacity // 2 - 2 * _MIB
        tb_max = max(8, (avail // per_token) // 8 * 8)

    tb = min(block_tokens, tb_max, _round_up(n, 8))
    tb = max(8, (tb // 8) * 8)

    n_pad = _round_up(n, tb)
    flat = jnp.pad(flat, (0, n_pad - n))
    num_blocks = n_pad // tb
    out_block_bytes = tb * d * itemsize

    if use_resident_table:
        vmem_need = 2 * table_bytes + 2 * out_block_bytes + tb * v * 4 + 2 * tb * 4
        cost = pl.CostEstimate(
            flops=int(2 * n_pad * v * d),
            transcendentals=0,
            bytes_accessed=int(table_bytes + n_pad * 4 + n_pad * d * itemsize),
        )
        out_flat = pl.pallas_call(
            _embed_onehot_kernel,
            out_shape=jax.ShapeDtypeStruct((n_pad, d), table.dtype),
            grid_spec=pltpu.PrefetchScalarGridSpec(
                num_scalar_prefetch=0,
                grid=(num_blocks,),
                in_specs=[
                    pl.BlockSpec((tb, 1), lambda i: (i, 0)),   # token block (VMEM)
                    # Constant index_map: fetched from HBM once, stays resident.
                    # TODO(synk): pipeline_mode=pl.Buffered(1) would halve the
                    # table's VMEM footprint once single-buffered pipelining is
                    # guaranteed for constant-index operands.
                    pl.BlockSpec((v, d), lambda i: (0, 0)),
                ],
                out_specs=pl.BlockSpec((tb, d), lambda i: (i, 0)),
            ),
            compiler_params=pltpu.CompilerParams(
                dimension_semantics=("parallel",),             # independent rows; 2 TCs on v7x
                vmem_limit_bytes=_vmem_limit(vmem_need, capacity),
            ),
            cost_estimate=cost,
        )(flat.reshape(n_pad, 1), table)
    else:
        vmem_need = 2 * out_block_bytes
        cost = pl.CostEstimate(
            flops=0,
            transcendentals=0,
            bytes_accessed=int(n_pad * 4 + 2 * n_pad * d * itemsize),
        )
        out_flat = pl.pallas_call(
            _embed_hbm_gather_kernel,
            out_shape=jax.ShapeDtypeStruct((n_pad, d), table.dtype),
            grid_spec=pltpu.PrefetchScalarGridSpec(
                num_scalar_prefetch=0,
                grid=(num_blocks,),
                in_specs=[
                    # Per-block token ids in SMEM: O(tb) SMEM, no size cliff.
                    pl.BlockSpec((tb,), lambda i: (i,),
                                 memory_space=pltpu.MemorySpace.SMEM),
                    # Table stays in HBM; rows gathered by manual DMA.
                    pl.BlockSpec(memory_space=pl.ANY),
                ],
                out_specs=pl.BlockSpec((tb, d), lambda i: (i, 0)),
                scratch_shapes=[pltpu.SemaphoreType.DMA((1,))],
            ),
            compiler_params=pltpu.CompilerParams(
                # No cross-step state: safe to shard the grid across cores.
                dimension_semantics=("parallel",),
                vmem_limit_bytes=_vmem_limit(vmem_need, capacity),
            ),
            cost_estimate=cost,
        )(flat, table)

    return out_flat[:n].reshape(*lead_shape, d)


# ---------------------------------------------------------------------------
# Module wrapper mirroring the PyTorch EmbeddingLayer
# ---------------------------------------------------------------------------
class EmbeddingLayer:
    """JAX/Pallas counterpart of the PyTorch EmbeddingLayer wrapper."""

    def __init__(self, layer, parameters):
        self.embedding_layer = layer(parameters)

    def __str__(self):
        return f"Embedding Layer Name : {self.embedding_layer}"

    def forward(self, tokens, parameters):
        return self.embedding_layer(tokens=tokens, parameters=parameters)


def make_table_embedding(parameters):
    """Factory passed as `layer`: returns a callable embedding layer."""
    table = parameters["table"]

    def _embed(*, tokens, parameters):
        # `parameters` may override the table at call time (mirrors the PyTorch
        # forward signature which re-passes parameters).
        tbl = parameters.get("table", table) if parameters is not None else table
        return embedding_lookup(tokens, tbl)

    return _embed


if __name__ == "__main__":
    # Small, deterministic setup.
    B, S = 2, 8          # batch, sequence
    V, D = 64, 128       # vocab size, embedding dim (lane-dense: D = 128)

    key = jax.random.PRNGKey(0)
    k_tab, k_tok = jax.random.split(key)
    table = jax.random.normal(k_tab, (V, D), dtype=jnp.float32)
    tokens = jax.random.randint(k_tok, (B, S), 0, V, dtype=jnp.int32)

    params = {"table": table}
    module = EmbeddingLayer(make_table_embedding, params)

    ref = table[tokens]

    # Fast path: VMEM-resident table, dense (TB, D) tiles, gather on the MXU.
    out = jax.block_until_ready(module.forward(tokens, params))
    assert out.shape == (B, S, D), out.shape
    assert jnp.allclose(out, ref), "VMEM-resident embedding gather mismatch"

    # Large-table path: HBM table + unrolled row-DMA gather, single batched wait.
    out_hbm = jax.block_until_ready(
        embedding_lookup(tokens, table, force_hbm_gather=True))
    assert out_hbm.shape == (B, S, D), out_hbm.shape
    assert jnp.allclose(out_hbm, ref), "HBM DMA embedding gather mismatch"

    print("KERNEL_OK")
</pallas_src>

<mosaic_0001>
module attributes {stable_mosaic.version = 11 : i64} {
  func.func @_embed_onehot_kernel(%arg0: i32, %arg1: memref<16x1xi32, #tpu.memory_space<vmem>>, %arg2: memref<64x128xf32, #tpu.memory_space<vmem>>, %arg3: memref<16x128xf32, #tpu.memory_space<vmem>>) attributes {dimension_semantics = [#tpu.dimension_semantics<parallel>], iteration_bounds = array<i64: 1>, scalar_prefetch = 0 : i64, scratch_operands = 0 : i64, tpu.core_type = #tpu.core_type<tc>, window_params = [{transform_indices = @transform_0, window_bounds = array<i64: 16, 1>}, {pipeline_mode = #tpu.pipeline_mode<synchronous>, transform_indices = @transform_1, window_bounds = array<i64: 64, 128>}, {transform_indices = @transform_2, window_bounds = array<i64: 16, 128>}]} {
    %c0 = arith.constant 0 : index
    %c0_0 = arith.constant 0 : index
    %0 = vector.load %arg1[%c0, %c0_0] : memref<16x1xi32, #tpu.memory_space<vmem>>, vector<16x1xi32>
    %c0_i32 = arith.constant 0 : i32
    %c63_i32 = arith.constant 63 : i32
    %1 = vector.broadcast %c0_i32 : i32 to vector<16x1xi32>
    %2 = arith.maxsi %1, %0 : vector<16x1xi32>
    %3 = vector.broadcast %c63_i32 : i32 to vector<16x1xi32>
    %4 = arith.minsi %3, %2 : vector<16x1xi32>
    %5 = tpu.iota {dimensions = array<i32: 1>} : vector<16x64xi32>
    %6 = vector.broadcast %4 : vector<16x1xi32> to vector<16x64xi32>
    %7 = arith.cmpi eq, %5, %6 : vector<16x64xi32>
    %8 = arith.extui %7 : vector<16x64xi1> to vector<16x64xi32>
    %9 = arith.sitofp %8 : vector<16x64xi32> to vector<16x64xf32>
    %c0_1 = arith.constant 0 : index
    %c0_2 = arith.constant 0 : index
    %10 = vector.load %arg2[%c0_1, %c0_2] : memref<64x128xf32, #tpu.memory_space<vmem>>, vector<64x128xf32>
    %cst = arith.constant dense<0.000000e+00> : vector<16x128xf32>
    %11 = tpu.matmul %9, %10, %cst {dimension_numbers = #tpu.dot_dimension_numbers<[1], [0], [0], [1], [0, 0, 1, 1], [], []>} : vector<16x64xf32>, vector<64x128xf32>, vector<16x128xf32> -> vector<16x128xf32>
    %c0_3 = arith.constant 0 : index
    %c0_4 = arith.constant 0 : index
    %12 = vector.load %arg3[%c0_3, %c0_4] : memref<16x128xf32, #tpu.memory_space<vmem>>, vector<16x128xf32>
    tpu.vector_store %arg3[%c0_3, %c0_4], %11 {strides = array<i32>} : memref<16x128xf32, #tpu.memory_space<vmem>>, vector<16x128xf32>,
    return
  }
  func.func @transform_0(%arg0: i32) -> (i32, i32) {
    %c0_i32 = arith.constant 0 : i32
    %c0_i32_0 = arith.constant 0 : i32
    return %arg0, %c0_i32 : i32, i32
  }
  func.func @transform_1(%arg0: i32) -> (i32, i32) {
    %c0_i32 = arith.constant 0 : i32
    %c0_i32_0 = arith.constant 0 : i32
    %c0_i32_1 = arith.constant 0 : i32
    return %c0_i32, %c0_i32_0 : i32, i32
  }
  func.func @transform_2(%arg0: i32) -> (i32, i32) {
    %c0_i32 = arith.constant 0 : i32
    %c0_i32_0 = arith.constant 0 : i32
    return %arg0, %c0_i32 : i32, i32
  }
}

</mosaic_0001>

<bundles_post_ra>
// kernel: tpu_custom_call.1
= control target key start
LH: loop header
LB: loop body
LE: loop exit
PB: predicated region body
PF: predicated region fallthrough
CT: control target
= control target key end

     0   :  { %7 = vsyncpa [#allocation3], 0  ;;  %s320_s0 = inlined_call_operand.vmem [shape: s32[16,1], index: 0, kind: input, shape index: {}]   ;;  %s321_s1 = inlined_call_operand.hbm [shape: f32[64,128], index: 1, kind: input, shape index: {}]   ;;  %s322_s2 = inlined_call_operand.hbm [shape: f32[16,128], index: 2, kind: output, shape index: {}]  }
   0x1   :  { %8 = vsyncpa [#allocation4], 0  ;;  %s263_s9 = smov [#allocation2]   ;;  %s215_s13 = scalar_lea.hbm %s321_s1, 1024 }
   0x2   :  { %s16_s10 = sshll.u32 %s263_s9, 4  ;;  %p216_p0 = scmp.ne.s32.totalorder %s321_s1, %s215_s13  ;;  %s17_s10 = int_to_ptr.vmem [resolvable:$true] %s16_s10 }
   0x3   :  { %p219_p1 = scmp.lt.u32.totalorder %s215_s13, %s321_s1 }
   0x5   :  { %p221_p2 = pnand %p219_p1, %p216_p0 }
   0x7   :  { %224 = shalt.err (!%p221_p2)
}
   0x8   :  { %s225_s18 = scalar_lea.vmem %s17_s10, 1024  ;;  %p230_p4 = scmp.lt.s32.totalorder %s17_s10, %s17_s10 }
   0x9   :  { %p226_p3 = scmp.ne.s32.totalorder %s17_s10, %s225_s18  ;;  %p231_p5 = scmp.lt.s32.totalorder %s225_s18, %s225_s18 }
   0xb   :  { %p232_p6 = por %p231_p5, %p230_p4 }
   0xd   :  { %p233_p7 = pnand %p232_p6, %p226_p3 }
   0xf   :  { %236 = shalt.err (!%p233_p7)
}
  0x10   :  { %s264_s19 = smov 128   ;;  %s265_s20 = smov 8  }
  0x11   :  { %22 = dma.hbm_to_vmem [thread:$0]  %s321_s1, 1024, %s17_s10, [#allocation3], %s264_s19, %s264_s19, %s265_s20  }
  0x12   :  { %259 = dma.done.wait [#allocation3], 1024  }
  0x13   :  { %260 = vsyncadd [#allocation3], 4294966272  ;;  %v266_v0 = vmov 0   ;;  %v26_v1 = vld [vmem:[%s320_s0] sm:$0xff]  ;;  %v27_v2 = vld [vmem:[%s320_s0 + $0x8] sm:$0xff]  ;;  %v36_v19 = vlaneseq  ;;  %vm58_vm4 = vcmask 523264  }
  0x14   :  { %214 = vset.pattern.permute.xlu0 %v266_v0  ;;  %v50_v3 = vld [vmem:[#allocation2] sm:$0xff]  ;;  %vm28_vm0 = vcmp.gt.s32.totalorder %v26_v1, 0  ;;  %vm30_vm1 = vcmp.gt.s32.totalorder %v27_v2, 0  ;;  %v51_v4 = vld [vmem:[#allocation2 + $0x8] sm:$0xff]  ;;  %v52_v5 = vld [vmem:[#allocation2 + $0x10] sm:$0xff]  ;;  %v267_v22 = vmov 0.0  }
  0x15   :  { %v53_v6 = vld [vmem:[#allocation2 + $0x18] sm:$0xff]  ;;  %v29_v7 = vsel %vm28_vm0, %v26_v1, 0  ;;  %v31_v8 = vsel %vm30_vm1, %v27_v2, 0  ;;  %v192_v9 = vpack.c.bf16 %v51_v4, %v50_v3  ;;  %v54_v11 = vld [vmem:[#allocation2 + $0x20] sm:$0xff]  ;;  %v55_v12 = vld [vmem:[#allocation2 + $0x28] sm:$0xff]  ;;  %v37_v20 = vand.u32 127, %v36_v19 }
  0x16   :  { %v196_v10 = vpack.c.bf16 %v53_v6, %v52_v5  ;;  %vm32_vm2 = vcmp.lt.s32.totalorder %v29_v7, 63  ;;  %vm34_vm3 = vcmp.lt.s32.totalorder %v31_v8, 63  ;;  %v200_v15 = vpack.c.bf16 %v55_v12, %v54_v11  ;;  %v56_v16 = vld [vmem:[#allocation2 + $0x30] sm:$0xff]  ;;  %v57_v17 = vld [vmem:[#allocation2 + $0x38] sm:$0xff]  ;;  %s268_s0 = smov [#allocation5]  }
  0x17   :  { %v33_v13 = vsel %vm32_vm2, %v29_v7, 63  ;;  %193 = vmatprep.subr.bf16.mxu0 %v192_v9  ;;  %v35_v14 = vsel %vm34_vm3, %v31_v8, 63  ;;  %v204_v18 = vpack.c.bf16 %v57_v17, %v56_v16  ;;  %s147_s1 = sshll.u32 %s268_s0, 4  ;;  %s148_s1 = int_to_ptr.vmem [resolvable:$true] %s147_s1 }
  0x18   :  { %39 = vperm.xlu0 %214, %v33_v13   ;;  %195 = vmatpush3.bf16.msra.mxu0 %v192_v9  ;;  %s237_s27 = scalar_lea.vmem %s148_s1, 256  ;;  %p242_p9 = scmp.lt.s32.totalorder %s148_s1, %s148_s1 }
  0x19   :  { %197 = vmatprep.subr.bf16.mxu0 %v196_v10  ;;  %p238_p8 = scmp.ne.s32.totalorder %s148_s1, %s237_s27  ;;  %p243_p10 = scmp.lt.s32.totalorder %s237_s27, %s237_s27 }
  0x1b   :  { %p244_p11 = por %p243_p10, %p242_p9 }
  0x1c   :  { %42 = vperm.xlu0 %214, %v35_v14   ;;  %199 = vmatpush3.bf16.msra.mxu0 %v196_v10 }
  0x1d   :  { %201 = vmatprep.subr.bf16.mxu0 %v200_v15  ;;  %p245_p12 = pnand %p244_p11, %p238_p8 }
  0x20   :  { %203 = vmatpush3.bf16.msra.mxu0 %v200_v15 }
  0x21   :  { %205 = vmatprep.subr.bf16.mxu0 %v204_v18 }
  0x24   :  { %207 = vmatpush3.bf16.msra.mxu0 %v204_v18 }
  0x97   :  { %v40_v21 = vpop.permute.xlu0 %39 }
  0x98   :  { %vm44_vm5 = vcmp.eq.s32.totalorder %v37_v20, %v40_v21 }
  0x99   :  { %v159_v23 = vsel %vm44_vm5, 1.0, %v267_v22 }
  0x9a   :  { %189 = vmatprep.mubr.msk.f32.mxu0 %vm58_vm4, %v159_v23 }
  0x9b   :  { %v43_v24 = vpop.permute.xlu0 %42 }
  0x9c   :  { %vm45_vm6 = vcmp.eq.s32.totalorder %v37_v20, %v43_v24 }
  0x9d   :  { %v160_v25 = vsel %vm45_vm6, 1.0, %v267_v22 }
  0x9e   :  { %190 = vmatmul.mubr.msk.f32.vlgmr.msra.gmra.mrb[0].mxu0 %vm58_vm4, %v160_v25 }
 0x171   :  { %v191_v26 = vpop.f32.mrb[0].mxu0 }
 0x172   :  { %141 = vst [vmem:[#allocation5 + $0x8] sm:$0xff] %v191_v26  ;;  %v131_v27 = vpop.f32.mrb[1].mxu0 }
 0x173   :  { %140 = vst [vmem:[#allocation5] sm:$0xff] %v131_v27 }
 0x174   :  { %248 = shalt.err (!%p245_p12)
}
 0x175   :  { %s249_s30 = scalar_lea.hbm %s322_s2, 256 }
 0x176   :  { %p250_p13 = scmp.ne.s32.totalorder %s322_s2, %s249_s30  ;;  %p253_p0 = scmp.lt.u32.totalorder %s249_s30, %s322_s2 }
 0x178   :  { %p255_p1 = pnand %p253_p0, %p250_p13 }
 0x17a   :  { %258 = shalt.err (!%p255_p1)
}
 0x17b   :  { %153 = dma.vmem_to_hbm [thread:$0]  %s148_s1, 256, %s322_s2, [#allocation4], %s264_s19, %s264_s19, %s265_s20  }
 0x17c   :  { %261 = dma.done.wait [#allocation4], 256  }
 0x17d   :  { %262 = vsyncadd [#allocation4], 4294967040 }
 0x17e   :  { %157 = vsyncpa [#allocation3], 1 }
 0x17f   :  { %158 = vsyncpa [#allocation4], 1 }

</bundles_post_ra>
